<compile_context>
chip_gen: v7x
topology: tpu7x:2x2x1
jax: 0.10.0
libtpu: 0.0.40
codegen_flags: <defaults>
</compile_context>

<pallas_src>
import math
from functools import partial

import jax
import jax.numpy as jnp
from jax.experimental import pallas as pl
from jax.experimental.pallas import tpu as pltpu


def _round_up(n, m):
    return ((n + m - 1) // m) * m


def _round_down(n, m):
    return (n // m) * m


def ppo_actor_critic_kernel(
    x_ref,       # (tm, K)     bf16   flattened, zero-padded input tile
    w1_ref,      # (K, 256)    bf16
    b1_ref,      # (1, 256)    f32
    w2_ref,      # (256, 128)  bf16
    b2_ref,      # (1, 128)    f32
    wh_ref,      # (128, N)    bf16   fused [actor | critic | zero-pad] head
    bh_ref,      # (1, N)      f32
    out_ref,     # (tm, N)     bf16   fused lane-dense output
):
    x = x_ref[...]

    # base: Linear -> ReLU -> Linear -> ReLU
    # (bf16 MXU operands, f32 accumulation; elementwise kept in f32)
    h1 = jnp.dot(x, w1_ref[...], preferred_element_type=jnp.float32) + b1_ref[...]
    h1 = jnp.maximum(h1, 0.0)
    h2 = jnp.dot(h1.astype(jnp.bfloat16), w2_ref[...],
                 preferred_element_type=jnp.float32) + b2_ref[...]
    h2 = jnp.maximum(h2, 0.0)

    # fused actor+critic head: one MXU pass, one unmasked lane-dense store
    y = jnp.dot(h2.astype(jnp.bfloat16), wh_ref[...],
                preferred_element_type=jnp.float32) + bh_ref[...]
    out_ref[...] = y.astype(out_ref.dtype)


def prepare_params(params, input_size):
    """One-time weight prep: K-pad w1, fuse actor/critic head, cast to bf16.

    Do this once (at init / after each optimizer step), NOT per forward call.
    """
    w1, b1 = params["w1"], params["b1"]
    w2, b2 = params["w2"], params["b2"]
    wa, ba = params["wa"], params["ba"]
    wc, bc = params["wc"], params["bc"]
    d_in = input_size
    A = wa.shape[1]
    H1 = w1.shape[1]          # 256
    H2 = w2.shape[1]          # 128

    K = _round_up(d_in, 128)                    # lane-dense contraction depth
    N = _round_up(A + 1, 128)                   # fused [actor | critic] width

    w1_p = jnp.zeros((K, H1), jnp.float32).at[:d_in, :].set(w1)
    wh = jnp.zeros((H2, N), jnp.float32).at[:, :A].set(wa).at[:, A:A + 1].set(wc)
    bh = jnp.zeros((1, N), jnp.float32).at[:, :A].set(ba).at[:, A:A + 1].set(bc)

    return dict(
        w1=w1_p.astype(jnp.bfloat16), b1=b1.astype(jnp.float32),
        w2=w2.astype(jnp.bfloat16), b2=b2.astype(jnp.float32),
        wh=wh.astype(jnp.bfloat16), bh=bh.astype(jnp.float32),
    )


@partial(jax.jit, static_argnames=("num_actions", "tm_max"))
def ppo_actor_critic_forward(x_nchw, prep, *, num_actions, tm_max=512):
    """x_nchw: (B, depth, height, width) float32. Returns (actor_logits, value)."""
    B = x_nchw.shape[0]
    d_in = math.prod(x_nchw.shape[1:])

    w1_bf, b1 = prep["w1"], prep["b1"]
    w2_bf, b2 = prep["w2"], prep["b2"]
    wh_bf, bh = prep["wh"], prep["bh"]
    K, H1 = w1_bf.shape
    H2, N = wh_bf.shape
    A = num_actions
    assert d_in <= K and A + 1 <= N
    out_dtype = jnp.bfloat16
    out_isz = jnp.dtype(out_dtype).itemsize

    # ---- row-tile selection -------------------------------------------------
    B16 = _round_up(max(B, 1), 16)
    tm = min(tm_max, B16)
    if B16 >= 32:
        # v7x: guarantee >= 2 grid steps so both TensorCores get work.
        tm = min(tm, _round_up(pl.cdiv(B16, 2), 16))

    # VMEM budget guard (conservative: assume everything double-buffered,
    # since we do not rely on Buffered(1) for the constant-index weights).
    weight_bytes = 2 * 2 * (K * H1 + H1 * H2 + H2 * N) + 2 * 4 * (H1 + H2 + N)
    per_row_bytes = 2 * 2 * K + 2 * out_isz * N + 4 * (H1 + H2 + N)  # x dbuf + out dbuf + f32 temps
    budget = 24 * 1024 * 1024   # safe under v7x 64 MiB physical VMEM
    avail = budget - weight_bytes
    if avail > per_row_bytes * 16:
        tm = min(tm, max(_round_down(avail // per_row_bytes, 16), 16))
    else:
        tm = 16   # very large d_in: weights dominate; K-axis streaming would be next
    Bp = _round_up(B16, tm)

    # ---- x: single fused cast + pad pass (bf16 first, then pad) -------------
    x_flat = x_nchw.reshape(B, d_in)            # matches nn.Flatten on NCHW
    x_bf = x_flat.astype(jnp.bfloat16)
    x_p = jnp.pad(x_bf, ((0, Bp - B), (0, K - d_in)))

    # ---- explicit scoped-VMEM limit from actual tile sizes ------------------
    est = (2 * tm * K * 2                 # x tile, double-buffered bf16
           + 2 * tm * N * out_isz         # out tile, double-buffered
           + weight_bytes                 # resident weights/biases (x2 safety)
           + tm * (H1 + H2 + N) * 4)      # f32 intermediates
    vmem_limit = min(max(int(est * 1.25) + (4 << 20), 16 << 20), 64 << 20)

    grid = (Bp // tm,)
    fused = pl.pallas_call(
        ppo_actor_critic_kernel,
        out_shape=jax.ShapeDtypeStruct((Bp, N), out_dtype),
        grid=grid,
        in_specs=[
            pl.BlockSpec((tm, K), lambda i: (i, 0)),   # x tile, pipelined over batch
            pl.BlockSpec((K, H1), lambda i: (0, 0)),   # weights resident across grid
            pl.BlockSpec((1, H1), lambda i: (0, 0)),
            pl.BlockSpec((H1, H2), lambda i: (0, 0)),
            pl.BlockSpec((1, H2), lambda i: (0, 0)),
            pl.BlockSpec((H2, N), lambda i: (0, 0)),
            pl.BlockSpec((1, N), lambda i: (0, 0)),
        ],
        out_specs=pl.BlockSpec((tm, N), lambda i: (i, 0)),
        compiler_params=pltpu.CompilerParams(
            dimension_semantics=("parallel",),          # shard batch tiles across TCs
            vmem_limit_bytes=vmem_limit),
    )(x_p, w1_bf, b1, w2_bf, b2, wh_bf, bh)

    actor = fused[:B, :A].astype(jnp.float32)
    critic = fused[:B, A:A + 1].astype(jnp.float32)
    return actor, critic


def init_params(key, input_size, num_actions):
    """Deterministic synthetic init (PyTorch-Linear-like uniform fan-in scaling),
    already in (in, out) layout."""
    def linear(k, fan_in, fan_out):
        kw, kb = jax.random.split(k)
        bound = 1.0 / jnp.sqrt(jnp.float32(fan_in))
        w = jax.random.uniform(kw, (fan_in, fan_out), jnp.float32, -bound, bound)
        b = jax.random.uniform(kb, (1, fan_out), jnp.float32, -bound, bound)
        return w, b

    k1, k2, k3, k4 = jax.random.split(key, 4)
    w1, b1 = linear(k1, input_size, 256)
    w2, b2 = linear(k2, 256, 128)
    wa, ba = linear(k3, 128, num_actions)
    wc, bc = linear(k4, 128, 1)
    return dict(w1=w1, b1=b1, w2=w2, b2=b2, wa=wa, ba=ba, wc=wc, bc=bc)


def _reference(x, params, input_size):
    xf = x.reshape(x.shape[0], input_size)
    h1 = jnp.maximum(xf @ params["w1"] + params["b1"], 0.0)
    h2 = jnp.maximum(h1 @ params["w2"] + params["b2"], 0.0)
    return h2 @ params["wa"] + params["ba"], h2 @ params["wc"] + params["bc"]


if __name__ == "__main__":
    # Small shapes consistent with the module: height=4, width=4, depth=4
    # -> input_size = 64; num_actions = 8; batch = 2 (plus a batch=64 case to
    # exercise the multi-step / two-TensorCore grid path).
    depth, height, width = 4, 4, 4
    num_actions = 8
    input_size = height * width * depth

    key = jax.random.PRNGKey(0)
    kx1, kx2, kp = jax.random.split(key, 3)
    params = init_params(kp, input_size, num_actions)
    prep = prepare_params(params, input_size)     # one-time weight prep (not per call)

    ok = True
    for kx, B in ((kx1, 2), (kx2, 64)):
        x = jax.random.normal(kx, (B, depth, height, width), jnp.float32)
        actor, critic = ppo_actor_critic_forward(x, prep, num_actions=num_actions)
        actor = jax.block_until_ready(actor)
        critic = jax.block_until_ready(critic)

        actor_ref, critic_ref = _reference(x, params, input_size)

        ok &= actor.shape == (B, num_actions) and critic.shape == (B, 1)
        # Tolerance reflects bf16 matmul operands + bf16 output store
        # (f32 accumulation inside the MXU).
        ok &= bool(jnp.allclose(actor, actor_ref, atol=5e-2, rtol=5e-2))
        ok &= bool(jnp.allclose(critic, critic_ref, atol=5e-2, rtol=5e-2))

    assert ok
    print("KERNEL_OK")
</pallas_src>

<mosaic_0001>
module attributes {stable_mosaic.version = 11 : i64} {
  func.func @ppo_actor_critic_kernel(%arg0: i32, %arg1: memref<16x128xbf16, #tpu.memory_space<vmem>>, %arg2: memref<128x256xbf16, #tpu.memory_space<vmem>>, %arg3: memref<1x256xf32, #tpu.memory_space<vmem>>, %arg4: memref<256x128xbf16, #tpu.memory_space<vmem>>, %arg5: memref<1x128xf32, #tpu.memory_space<vmem>>, %arg6: memref<128x128xbf16, #tpu.memory_space<vmem>>, %arg7: memref<1x128xf32, #tpu.memory_space<vmem>>, %arg8: memref<16x128xbf16, #tpu.memory_space<vmem>>) attributes {dimension_semantics = [#tpu.dimension_semantics<parallel>], iteration_bounds = array<i64: 1>, scalar_prefetch = 0 : i64, scratch_operands = 0 : i64, tpu.core_type = #tpu.core_type<tc>, window_params = [{transform_indices = @transform_0, window_bounds = array<i64: 16, 128>}, {pipeline_mode = #tpu.pipeline_mode<synchronous>, transform_indices = @transform_1, window_bounds = array<i64: 128, 256>}, {pipeline_mode = #tpu.pipeline_mode<synchronous>, transform_indices = @transform_2, window_bounds = array<i64: 1, 256>}, {pipeline_mode = #tpu.pipeline_mode<synchronous>, transform_indices = @transform_3, window_bounds = array<i64: 256, 128>}, {pipeline_mode = #tpu.pipeline_mode<synchronous>, transform_indices = @transform_4, window_bounds = array<i64: 1, 128>}, {pipeline_mode = #tpu.pipeline_mode<synchronous>, transform_indices = @transform_5, window_bounds = array<i64: 128, 128>}, {pipeline_mode = #tpu.pipeline_mode<synchronous>, transform_indices = @transform_6, window_bounds = array<i64: 1, 128>}, {transform_indices = @transform_7, window_bounds = array<i64: 16, 128>}]} {
    %c0 = arith.constant 0 : index
    %c0_0 = arith.constant 0 : index
    %0 = vector.load %arg1[%c0, %c0_0] : memref<16x128xbf16, #tpu.memory_space<vmem>>, vector<16x128xbf16>
    %c0_1 = arith.constant 0 : index
    %c0_2 = arith.constant 0 : index
    %1 = vector.load %arg2[%c0_1, %c0_2] : memref<128x256xbf16, #tpu.memory_space<vmem>>, vector<128x256xbf16>
    %cst = arith.constant dense<0.000000e+00> : vector<16x256xf32>
    %2 = tpu.matmul %0, %1, %cst {dimension_numbers = #tpu.dot_dimension_numbers<[1], [0], [0], [1], [0, 0, 1, 1], [], []>} : vector<16x128xbf16>, vector<128x256xbf16>, vector<16x256xf32> -> vector<16x256xf32>
    %c0_3 = arith.constant 0 : index
    %c0_4 = arith.constant 0 : index
    %3 = vector.load %arg3[%c0_3, %c0_4] : memref<1x256xf32, #tpu.memory_space<vmem>>, vector<1x256xf32>
    %4 = vector.broadcast %3 : vector<1x256xf32> to vector<16x256xf32>
    %5 = arith.addf %2, %4 : vector<16x256xf32>
    %cst_5 = arith.constant 0.000000e+00 : f32
    %6 = vector.broadcast %cst_5 : f32 to vector<16x256xf32>
    %7 = arith.maximumf %5, %6 : vector<16x256xf32>
    %8 = arith.truncf %7 : vector<16x256xf32> to vector<16x256xbf16>
    %c0_6 = arith.constant 0 : index
    %c0_7 = arith.constant 0 : index
    %9 = vector.load %arg4[%c0_6, %c0_7] : memref<256x128xbf16, #tpu.memory_space<vmem>>, vector<256x128xbf16>
    %cst_8 = arith.constant dense<0.000000e+00> : vector<16x128xf32>
    %10 = tpu.matmul %8, %9, %cst_8 {dimension_numbers = #tpu.dot_dimension_numbers<[1], [0], [0], [1], [0, 0, 1, 1], [], []>} : vector<16x256xbf16>, vector<256x128xbf16>, vector<16x128xf32> -> vector<16x128xf32>
    %c0_9 = arith.constant 0 : index
    %c0_10 = arith.constant 0 : index
    %11 = vector.load %arg5[%c0_9, %c0_10] : memref<1x128xf32, #tpu.memory_space<vmem>>, vector<1x128xf32>
    %12 = vector.broadcast %11 : vector<1x128xf32> to vector<16x128xf32>
    %13 = arith.addf %10, %12 : vector<16x128xf32>
    %cst_11 = arith.constant 0.000000e+00 : f32
    %14 = vector.broadcast %cst_11 : f32 to vector<16x128xf32>
    %15 = arith.maximumf %13, %14 : vector<16x128xf32>
    %16 = arith.truncf %15 : vector<16x128xf32> to vector<16x128xbf16>
    %c0_12 = arith.constant 0 : index
    %c0_13 = arith.constant 0 : index
    %17 = vector.load %arg6[%c0_12, %c0_13] : memref<128x128xbf16, #tpu.memory_space<vmem>>, vector<128x128xbf16>
    %cst_14 = arith.constant dense<0.000000e+00> : vector<16x128xf32>
    %18 = tpu.matmul %16, %17, %cst_14 {dimension_numbers = #tpu.dot_dimension_numbers<[1], [0], [0], [1], [0, 0, 1, 1], [], []>} : vector<16x128xbf16>, vector<128x128xbf16>, vector<16x128xf32> -> vector<16x128xf32>
    %c0_15 = arith.constant 0 : index
    %c0_16 = arith.constant 0 : index
    %19 = vector.load %arg7[%c0_15, %c0_16] : memref<1x128xf32, #tpu.memory_space<vmem>>, vector<1x128xf32>
    %20 = vector.broadcast %19 : vector<1x128xf32> to vector<16x128xf32>
    %21 = arith.addf %18, %20 : vector<16x128xf32>
    %22 = arith.truncf %21 : vector<16x128xf32> to vector<16x128xbf16>
    %c0_17 = arith.constant 0 : index
    %c0_18 = arith.constant 0 : index
    %23 = vector.load %arg8[%c0_17, %c0_18] : memref<16x128xbf16, #tpu.memory_space<vmem>>, vector<16x128xbf16>
    tpu.vector_store %arg8[%c0_17, %c0_18], %22 {strides = array<i32>} : memref<16x128xbf16, #tpu.memory_space<vmem>>, vector<16x128xbf16>,
    return
  }
  func.func @transform_0(%arg0: i32) -> (i32, i32) {
    %c0_i32 = arith.constant 0 : i32
    %c0_i32_0 = arith.constant 0 : i32
    return %arg0, %c0_i32 : i32, i32
  }
  func.func @transform_1(%arg0: i32) -> (i32, i32) {
    %c0_i32 = arith.constant 0 : i32
    %c0_i32_0 = arith.constant 0 : i32
    %c0_i32_1 = arith.constant 0 : i32
    return %c0_i32, %c0_i32_0 : i32, i32
  }
  func.func @transform_2(%arg0: i32) -> (i32, i32) {
    %c0_i32 = arith.constant 0 : i32
    %c0_i32_0 = arith.constant 0 : i32
    %c0_i32_1 = arith.constant 0 : i32
    return %c0_i32, %c0_i32_0 : i32, i32
  }
  func.func @transform_3(%arg0: i32) -> (i32, i32) {
    %c0_i32 = arith.constant 0 : i32
    %c0_i32_0 = arith.constant 0 : i32
    %c0_i32_1 = arith.constant 0 : i32
    return %c0_i32, %c0_i32_0 : i32, i32
  }
  func.func @transform_4(%arg0: i32) -> (i32, i32) {
    %c0_i32 = arith.constant 0 : i32
    %c0_i32_0 = arith.constant 0 : i32
    %c0_i32_1 = arith.constant 0 : i32
    return %c0_i32, %c0_i32_0 : i32, i32
  }
  func.func @transform_5(%arg0: i32) -> (i32, i32) {
    %c0_i32 = arith.constant 0 : i32
    %c0_i32_0 = arith.constant 0 : i32
    %c0_i32_1 = arith.constant 0 : i32
    return %c0_i32, %c0_i32_0 : i32, i32
  }
  func.func @transform_6(%arg0: i32) -> (i32, i32) {
    %c0_i32 = arith.constant 0 : i32
    %c0_i32_0 = arith.constant 0 : i32
    %c0_i32_1 = arith.constant 0 : i32
    return %c0_i32, %c0_i32_0 : i32, i32
  }
  func.func @transform_7(%arg0: i32) -> (i32, i32) {
    %c0_i32 = arith.constant 0 : i32
    %c0_i32_0 = arith.constant 0 : i32
    return %arg0, %c0_i32 : i32, i32
  }
}

</mosaic_0001>

<bundles_post_ra>
// kernel: ppo_actor_critic_forward.1
= control target key start
LH: loop header
LB: loop body
LE: loop exit
PB: predicated region body
PF: predicated region fallthrough
CT: control target
= control target key end

     0   :  { %12 = vsyncpa [#allocation3], 0  ;;  %s848_s0 = inlined_call_operand.vmem [shape: bf16[16,128], index: 0, kind: input, shape index: {}]   ;;  %s849_s1 = inlined_call_operand.hbm [shape: bf16[128,256], index: 1, kind: input, shape index: {}]   ;;  %s850_s2 = inlined_call_operand.vmem [shape: f32[1,256], index: 2, kind: input, shape index: {}]   ;;  %s851_s3 = inlined_call_operand.hbm [shape: bf16[256,128], index: 3, kind: input, shape index: {}]   ;;  %s852_s4 = inlined_call_operand.vmem [shape: f32[1,128], index: 4, kind: input, shape index: {}]   ;;  %s853_s5 = inlined_call_operand.vmem [shape: bf16[128,128], index: 5, kind: input, shape index: {}]   ;;  %s854_s6 = inlined_call_operand.vmem [shape: f32[1,128], index: 6, kind: input, shape index: {}]   ;;  %s855_s7 = inlined_call_operand.vmem [shape: bf16[16,128], index: 7, kind: output, shape index: {}]  }
   0x1   :  { %13 = vsyncpa [#allocation5], 0  ;;  %s736_s24 = smov [#allocation2]   ;;  %s688_s28 = scalar_lea.hbm %s849_s1, 2048 }
   0x2   :  { %s21_s25 = sshll.u32 %s736_s24, 4  ;;  %p689_p0 = scmp.ne.s32.totalorder %s849_s1, %s688_s28  ;;  %s22_s25 = int_to_ptr.vmem [resolvable:$true] %s21_s25 }
   0x3   :  { %p692_p1 = scmp.lt.u32.totalorder %s688_s28, %s849_s1 }
   0x5   :  { %p694_p2 = pnand %p692_p1, %p689_p0 }
   0x7   :  { %697 = shalt.err (!%p694_p2)
}
   0x8   :  { %s698_s10 = scalar_lea.vmem %s22_s25, 2048  ;;  %p703_p4 = scmp.lt.s32.totalorder %s22_s25, %s22_s25 }
   0x9   :  { %p699_p3 = scmp.ne.s32.totalorder %s22_s25, %s698_s10  ;;  %p704_p5 = scmp.lt.s32.totalorder %s698_s10, %s698_s10 }
   0xb   :  { %p705_p6 = por %p704_p5, %p703_p4 }
   0xd   :  { %p706_p7 = pnand %p705_p6, %p699_p3 }
   0xf   :  { %709 = shalt.err (!%p706_p7)
}
  0x10   :  { %s737_s11 = smov 128   ;;  %s738_s12 = smov 8  }
  0x11   :  { %27 = dma.hbm_to_vmem [thread:$0]  %s849_s1, 2048, %s22_s25, [#allocation3], %s737_s11, %s737_s11, %s738_s12  }
  0x12   :  { %s739_s15 = smov [#allocation4]   ;;  %s710_s19 = scalar_lea.hbm %s851_s3, 2048 }
  0x13   :  { %s35_s16 = sshll.u32 %s739_s15, 4  ;;  %p711_p8 = scmp.ne.s32.totalorder %s851_s3, %s710_s19  ;;  %s36_s16 = int_to_ptr.vmem [resolvable:$true] %s35_s16 }
  0x14   :  { %p714_p9 = scmp.lt.u32.totalorder %s710_s19, %s851_s3 }
  0x16   :  { %p716_p10 = pnand %p714_p9, %p711_p8 }
  0x18   :  { %719 = shalt.err (!%p716_p10)
}
  0x19   :  { %s720_s24 = scalar_lea.vmem %s36_s16, 2048  ;;  %p725_p12 = scmp.lt.s32.totalorder %s36_s16, %s36_s16 }
  0x1a   :  { %p721_p11 = scmp.ne.s32.totalorder %s36_s16, %s720_s24  ;;  %p726_p13 = scmp.lt.s32.totalorder %s720_s24, %s720_s24 }
  0x1c   :  { %p727_p0 = por %p726_p13, %p725_p12 }
  0x1e   :  { %p728_p1 = pnand %p727_p0, %p721_p11 }
  0x20   :  { %731 = shalt.err (!%p728_p1)
}
  0x21   :  { %s740_s1 = smov 64   ;;  %s741_s25 = smov 4  }
  0x22   :  { %41 = dma.hbm_to_vmem [thread:$0]  %s851_s3, 2048, %s36_s16, [#allocation5], %s740_s1, %s740_s1, %s741_s25  }
  0x23   :  { %732 = dma.done.wait [#allocation3], 2048  }
  0x24   :  { %733 = vsyncadd [#allocation3], 4294965248 }
  0x25   :  { %734 = dma.done.wait [#allocation5], 2048  }
  0x26   :  { %735 = vsyncadd [#allocation5], 4294965248  ;;  %v742_v0 = vmov 0   ;;  %v639_v1 = vld [vmem:[#allocation2 + $0x4] ss:$8 sps:$4 sm:$0xff]   ;;  %v668_v16 = vld [vmem:[#allocation4 + $0x50] sm:$0xff]   ;;  %v75_v40 = vlaneseq }
  0x27   :  { %203 = vmatprep.mubr.bf16.mxu0 %v742_v0  ;;  %v641_v2 = vld [vmem:[#allocation2] ss:$8 sps:$4 sm:$0xff]   ;;  %171 = vmatprep.subr.bf16.mxu0 %v639_v1  ;;  %v642_v3 = vld [vmem:[#allocation2 + $0x14] ss:$8 sps:$4 sm:$0xff]   ;;  %v644_v4 = vld [vmem:[#allocation2 + $0x10] ss:$8 sps:$4 sm:$0xff]  }
  0x28   :  { %172 = vmatpush1.bf16.msra.mxu0 %v641_v2  ;;  %v645_v5 = vld [vmem:[#allocation2 + $0x24] ss:$8 sps:$4 sm:$0xff]   ;;  %v647_v6 = vld [vmem:[#allocation2 + $0x20] ss:$8 sps:$4 sm:$0xff]   ;;  %v648_v7 = vld [vmem:[#allocation2 + $0x34] ss:$8 sps:$4 sm:$0xff]  }
  0x29   :  { %173 = vmatprep.subr.bf16.mxu0 %v642_v3  ;;  %v650_v8 = vld [vmem:[#allocation2 + $0x30] ss:$8 sps:$4 sm:$0xff]   ;;  %v651_v9 = vld [vmem:[#allocation2 + $0x44] ss:$8 sps:$4 sm:$0xff]   ;;  %v653_v11 = vld [vmem:[#allocation2 + $0x40] ss:$8 sps:$4 sm:$0xff]  }
  0x2a   :  { %v664_v10 = vld [vmem:[#allocation4 + $0x40] sm:$0xff]   ;;  %v654_v13 = vld [vmem:[#allocation2 + $0x54] ss:$8 sps:$4 sm:$0xff]   ;;  %v666_v14 = vld [vmem:[#allocation4 + $0x48] sm:$0xff]   ;;  %v743_v35 = vmov 0.0   ;;  %v76_v41 = vshrl.u32 %v75_v40, 7 }
  0x2b   :  { %v665_v12 = vld [vmem:[#allocation4] sm:$0xff]   ;;  %579 = vmatprep.subr.bf16.mxu1 %v664_v10  ;;  %v667_v15 = vld [vmem:[#allocation4 + $0x8] sm:$0xff]   ;;  %v656_v17 = vld [vmem:[#allocation2 + $0x50] ss:$8 sps:$4 sm:$0xff]   ;;  %vm744_vm0 = vmmov 0  }
  0x2c   :  { %174 = vmatpush1.bf16.msra.mxu0 %v644_v4  ;;  %580 = vmatpush3.bf16.msra.mxu1 %v665_v12  ;;  %v657_v18 = vld [vmem:[#allocation2 + $0x64] ss:$8 sps:$4 sm:$0xff]   ;;  %v669_v19 = vld [vmem:[#allocation4 + $0x10] sm:$0xff]   ;;  %v670_v20 = vld [vmem:[#allocation4 + $0x58] sm:$0xff]   ;;  %v77_v42 = vsub.s32 0, %v76_v41  ;;  %v81_v44 = vsub.s32 1, %v76_v41 }
  0x2d   :  { %175 = vmatprep.subr.bf16.mxu0 %v645_v5  ;;  %581 = vmatprep.subr.bf16.mxu1 %v666_v14  ;;  %v659_v21 = vld [vmem:[#allocation2 + $0x60] ss:$8 sps:$4 sm:$0xff]   ;;  %v660_v22 = vld [vmem:[#allocation2 + $0x74] ss:$8 sps:$4 sm:$0xff]   ;;  %v662_v25 = vld [vmem:[#allocation2 + $0x70] ss:$8 sps:$4 sm:$0xff]  }
  0x2e   :  { %v671_v23 = vld [vmem:[#allocation4 + $0x18] sm:$0xff]   ;;  %v672_v24 = vld [vmem:[#allocation4 + $0x60] sm:$0xff]   ;;  %v674_v27 = vld [vmem:[#allocation4 + $0x68] sm:$0xff]  }
  0x2f   :  { %v673_v26 = vld [vmem:[#allocation4 + $0x20] sm:$0xff]   ;;  %v675_v29 = vld [vmem:[#allocation4 + $0x28] sm:$0xff]   ;;  %v676_v30 = vld [vmem:[#allocation4 + $0x70] sm:$0xff]  }
  0x30   :  { %176 = vmatpush1.bf16.msra.mxu0 %v647_v6  ;;  %582 = vmatpush3.bf16.msra.mxu1 %v667_v15  ;;  %v663_v28 = vld [vmem:[%s848_s0] sm:$0xff]   ;;  %v677_v31 = vld [vmem:[#allocation4 + $0x30] sm:$0xff]   ;;  %v678_v32 = vld [vmem:[#allocation4 + $0x78] sm:$0xff]  }
  0x31   :  { %177 = vmatprep.subr.bf16.mxu0 %v648_v7  ;;  %583 = vmatprep.subr.bf16.mxu1 %v668_v16  ;;  %v679_v33 = vld [vmem:[#allocation4 + $0x38] sm:$0xff]   ;;  %v680_v34 = vld [vmem:[%s853_s5] sm:$0xff]   ;;  %v681_v36 = vld [vmem:[%s853_s5 + $0x8] sm:$0xff]  }
  0x32   :  { %v682_v37 = vld [vmem:[%s853_s5 + $0x10] sm:$0xff]   ;;  %v683_v38 = vld [vmem:[%s853_s5 + $0x18] sm:$0xff]   ;;  %v684_v39 = vld [vmem:[%s853_s5 + $0x20] sm:$0xff]  }
  0x33   :  { %v73_v43 = vld [vmem:[%s850_s2] sm:$0x3]  ;;  %v685_v61 = vld [vmem:[%s853_s5 + $0x28] sm:$0xff]   ;;  %v686_v62 = vld [vmem:[%s853_s5 + $0x30] sm:$0xff]  }
  0x34   :  { %178 = vmatpush1.bf16.msra.mxu0 %v650_v8  ;;  %584 = vmatpush3.bf16.msra.mxu1 %v669_v19  ;;  %v78_v45 = vrot.slane %v73_v43, %v77_v42  ;;  %v82_v46 = vrot.slane %v73_v43, %v81_v44  ;;  %v687_v63 = vld [vmem:[%s853_s5 + $0x38] sm:$0xff]   ;;  %v544_v1 = vld [vmem:[%s852_s4] ss:$0 sm:$0xff] }
  0x35   :  { %179 = vmatprep.subr.bf16.mxu0 %v651_v9  ;;  %585 = vmatprep.subr.bf16.mxu1 %v670_v20  ;;  %v561_v12 = vld [vmem:[%s854_s6] ss:$0 sm:$0xff] }
  0x38   :  { %180 = vmatpush1.bf16.msra.mxu0 %v653_v11  ;;  %586 = vmatpush3.bf16.msra.mxu1 %v671_v23 }
  0x39   :  { %181 = vmatprep.subr.bf16.mxu0 %v654_v13  ;;  %587 = vmatprep.subr.bf16.mxu1 %v672_v24 }
  0x3c   :  { %182 = vmatpush1.bf16.msra.mxu0 %v656_v17  ;;  %588 = vmatpush3.bf16.msra.mxu1 %v673_v26 }
  0x3d   :  { %183 = vmatprep.subr.bf16.mxu0 %v657_v18  ;;  %589 = vmatprep.subr.bf16.mxu1 %v674_v27 }
  0x40   :  { %184 = vmatpush1.bf16.msra.mxu0 %v659_v21  ;;  %590 = vmatpush3.bf16.msra.mxu1 %v675_v29 }
  0x41   :  { %185 = vmatprep.subr.bf16.mxu0 %v660_v22  ;;  %591 = vmatprep.subr.bf16.mxu1 %v676_v30 }
  0x44   :  { %186 = vmatpush1.bf16.msra.mxu0 %v662_v25  ;;  %592 = vmatpush3.bf16.msra.mxu1 %v677_v31 }
  0x45   :  { %593 = vmatprep.subr.bf16.mxu1 %v678_v32  ;;  %610 = vmatprep.subr.bf16.mxu0 %v743_v35 }
  0x47   :  { %204 = vmatmul.mubr.bf16.vlgmr.msra.gmra.mrb[0].mxu0 %v663_v28 }
  0x48   :  { %594 = vmatpush3.bf16.msra.mxu1 %v679_v33  ;;  %611 = vmatpush3.bf16.msra.mxu0 %v680_v34 }
  0x49   :  { %612 = vmatprep.subr.bf16.mxu0 %v743_v35  ;;  %626 = vmatprep.mubr.msk.bf16.mxu0 %vm744_vm0, %v743_v35 }
  0x4c   :  { %613 = vmatpush3.bf16.msra.mxu0 %v681_v36 }
  0x4d   :  { %614 = vmatprep.subr.bf16.mxu0 %v743_v35 }
  0x50   :  { %615 = vmatpush3.bf16.msra.mxu0 %v682_v37 }
  0x51   :  { %616 = vmatprep.subr.bf16.mxu0 %v743_v35 }
  0x54   :  { %617 = vmatpush3.bf16.msra.mxu0 %v683_v38 }
  0x55   :  { %618 = vmatprep.subr.bf16.mxu0 %v743_v35 }
  0x58   :  { %619 = vmatpush3.bf16.msra.mxu0 %v684_v39 }
  0x59   :  { %620 = vmatprep.subr.bf16.mxu0 %v743_v35 }
  0x5c   :  { %621 = vmatpush3.bf16.msra.mxu0 %v685_v61 }
  0x5d   :  { %622 = vmatprep.subr.bf16.mxu0 %v743_v35 }
  0x60   :  { %623 = vmatpush3.bf16.msra.mxu0 %v686_v62 }
  0x61   :  { %624 = vmatprep.subr.bf16.mxu0 %v743_v35 }
  0x64   :  { %625 = vmatpush3.bf16.msra.mxu0 %v687_v63 }
 0x11a   :  { %v205_v47 = vpop.f32.mrb[0].mxu0 }
 0x11b   :  { %v206_v48 = vadd.f32 %v205_v47, %v78_v45  ;;  %v207_v49 = vpop.f32.mrb[1].mxu0 }
 0x11c   :  { %v208_v50 = vadd.f32 %v207_v49, %v82_v46  ;;  %v209_v51 = vpop.f32.mrb[2].mxu0 }
 0x11d   :  { %v210_v52 = vadd.f32 %v209_v51, %v78_v45  ;;  %v211_v53 = vpop.f32.mrb[3].mxu0  ;;  %v214_v55 = vmax.f32 %v206_v48, 0.0 }
 0x11e   :  { %v212_v54 = vadd.f32 %v211_v53, %v82_v46  ;;  %v215_v57 = vmax.f32 %v208_v50, 0.0 }
 0x11f   :  { %v216_v56 = vmax.f32 %v210_v52, 0.0 }
 0x120   :  { %v217_v58 = vmax.f32 %v212_v54, 0.0 }
 0x121   :  { %v218_v59 = vpack.c.bf16 %v216_v56, %v214_v55 }
 0x122   :  { %v219_v60 = vpack.c.bf16 %v217_v58, %v215_v57 }
 0x124   :  { %387 = vmatprep.mubr.bf16.mxu1 %v219_v60 }
 0x125   :  { %388 = vmatmul.mubr.bf16.vlgmr.msra.gmra.mrb[0].mxu1 %v218_v59 }
 0x1f8   :  { %v595_v0 = vpop.f32.mrb[0].mxu1 }
 0x1f9   :  { %v596_v2 = vpop.f32.mrb[1].mxu1 }
 0x1fa   :  { %v597_v3 = vadd.f32 %v596_v2, %v595_v0  ;;  %v598_v4 = vpop.f32.mrb[2].mxu1 }
 0x1fb   :  { %v599_v5 = vpop.f32.mrb[3].mxu1 }
 0x1fc   :  { %v390_v6 = vadd.f32 %v597_v3, %v544_v1  ;;  %v600_v7 = vadd.f32 %v599_v5, %v598_v4 }
 0x1fe   :  { %v393_v8 = vadd.f32 %v600_v7, %v544_v1  ;;  %v396_v9 = vmax.f32 %v390_v6, 0.0 }
 0x200   :  { %v397_v10 = vmax.f32 %v393_v8, 0.0 }
 0x202   :  { %v398_v11 = vpack.c.bf16 %v397_v10, %v396_v9 }
 0x204   :  { %627 = vmatmul.mubr.bf16.vlgmr.msra.gmra.mrb[4].mxu0 %v398_v11 }
 0x2d7   :  { %v504_v13 = vpop.f32.mrb[4].mxu0 }
 0x2d8   :  { %v628_v14 = vpop.f32.mrb[5].mxu0  ;;  %v505_v16 = vadd.f32 %v561_v12, %v504_v13 }
 0x2d9   :  { %v507_v15 = vpop.f32.mrb[6].mxu0 }
 0x2da   :  { %v508_v17 = vadd.f32 %v561_v12, %v507_v15  ;;  %v629_v18 = vpop.f32.mrb[7].mxu0 }
 0x2dc   :  { %v577_v19 = vpack.c.bf16 %v508_v17, %v505_v16 }
 0x2de   :  { %578 = vst [vmem:[%s855_s7] sm:$0xff] %v577_v19  }
 0x2df   :  { %525 = vsyncpa [#allocation3], 1 }
 0x2e0   :  { %526 = vsyncpa [#allocation5], 1 }

</bundles_post_ra>
